<compile_context>
chip_gen: v5e
topology: v5e:2x2
jax: 0.10.0
libtpu: 0.0.40
codegen_flags: <defaults>
</compile_context>

<pallas_src>
import functools

import jax
import jax.numpy as jnp
from jax import lax
from jax.experimental import pallas as pl
from jax.experimental.pallas import tpu as pltpu


def _vmem_capacity_bytes():
    """Physical VMEM per TensorCore (fallback: 128 MiB for v5e/v6e)."""
    try:
        return int(pltpu.get_tpu_info().vmem_capacity_bytes)
    except Exception:  # pragma: no cover - conservative fallback off-TPU
        return 128 * 1024 * 1024


def _single_buffered(block_shape, index_map):
    """BlockSpec for a grid-invariant operand: one VMEM buffer is enough."""
    try:
        return pl.BlockSpec(block_shape, index_map, pipeline_mode=pl.Buffered(1))
    except (AttributeError, TypeError):  # pragma: no cover - older jax fallback
        return pl.BlockSpec(block_shape, index_map)


def _proj_kernel(x_ref, g_ref, beta_ref, w_ref, bias_ref, q_ref, kv_ref,
                 *, eps, embed_dim):
    # x_ref: (1, tS, E); g/beta: (1, E); w: (E, 3E) pre-summed+permuted+scaled
    # (MXU dtype); bias: (1, 3E) f32. Outputs: q (1, tS, E), kv (1, tS, 2E).
    x = x_ref[0].astype(jnp.float32)                        # (tS, E)
    mean = jnp.mean(x, axis=-1, keepdims=True)
    cent = x - mean
    var = jnp.mean(cent * cent, axis=-1, keepdims=True)
    xn = cent * lax.rsqrt(var + eps)
    xn = xn * g_ref[...].astype(jnp.float32) + beta_ref[...].astype(jnp.float32)
    # Feed the MXU in the weight dtype (bf16 for f32 models); accumulate in f32.
    y = jnp.dot(xn.astype(w_ref.dtype), w_ref[...],
                preferred_element_type=jnp.float32)         # (tS, 3E)
    y = y + bias_ref[...].astype(jnp.float32)
    E = embed_dim
    q_ref[0] = y[:, :E].astype(q_ref.dtype)                 # Q (scale folded in)
    kv_ref[0] = y[:, E:].astype(kv_ref.dtype)               # [K | V]


def _attn_kernel(q_ref, kv_ref, o_ref, *, embed_dim, head_size, num_heads):
    # q_ref: (1, tQ, E) merged-head Q (already scaled by 1/sqrt(hs))
    # kv_ref: (1, S, 2E) merged-head [K | V] for the whole sequence
    # o_ref: (1, tQ, E) merged-head output (lane-dense)
    E, hs, H = embed_dim, head_size, num_heads
    q = q_ref[0]                                            # (tQ, E)
    kv = kv_ref[0]                                          # (S, 2E)
    # TODO(synk): for very long S, switch to flash-style online softmax over kv
    # tiles -- this version materializes one (tQ, S) f32 score block per head.
    # TODO(synk): on v6e/v7x the single EUP slot (exp) binds for hs <= 64; a
    # bf16 exp roughly doubles its throughput (keep f32 exp on v5e).
    for h in range(H):  # static unroll; per-head result stored immediately so
        #                 live ranges stay one head deep (no concat at the end)
        lo, hi = h * hs, (h + 1) * hs
        qh = q[:, lo:hi]                                    # (tQ, hs)
        kh = kv[:, lo:hi]                                   # (S, hs)
        vh = kv[:, E + lo:E + hi]                           # (S, hs)
        # contract the last dims of q and k directly -> no XLU transpose of K
        s = lax.dot_general(
            qh, kh, dimension_numbers=(((1,), (1,)), ((), ())),
            preferred_element_type=jnp.float32)             # (tQ, S)
        m = jnp.max(s, axis=-1, keepdims=True)
        e = jnp.exp(s - m)
        l = jnp.sum(e, axis=-1, keepdims=True)
        p = e * pl.reciprocal(l, approx=True)
        oh = jnp.dot(p.astype(vh.dtype), vh,
                     preferred_element_type=jnp.float32)    # (tQ, hs)
        o_ref[0, :, lo:hi] = oh.astype(o_ref.dtype)


def multihead_attention(x, gamma, beta, w, b, head_size):
    """x: (B, S, E); gamma/beta: (E,); w: (3E, 3E) torch Linear weight (out,in); b: (3E,)."""
    B, S, E = x.shape
    hs = head_size
    H = E // hs
    E3 = 3 * E

    # MXU / intermediate dtype: bf16 when the model is f32, else the model dtype.
    mxu_dtype = jnp.bfloat16 if x.dtype == jnp.float32 else x.dtype

    # ---- host-side parameter prep (cheap O(E*3E); hoist outside jit if the
    # ---- weights are static) --------------------------------------------------
    # repeat(1,1,3) @ W.T  ==  xn @ (W.T[:E] + W.T[E:2E] + W.T[2E:])   (exact)
    wt = w.T                                                # (3E_in, 3E_out)
    w_sum = wt[:E] + wt[E:2 * E] + wt[2 * E:]               # (E, 3E)
    # Permute output columns so the projection directly emits [Q | K | V], each
    # already in merged-head (h*hs + d) order -> no head-split/merge transposes.
    d = jnp.arange(E)
    q_cols = (d // hs) * (3 * hs) + (d % hs)
    perm = jnp.concatenate([q_cols, q_cols + hs, q_cols + 2 * hs])
    # Fold the attention scale 1/sqrt(hs) into the Q columns (exact math).
    scale = jnp.float32(hs) ** -0.5
    col_scale = jnp.where(jnp.arange(E3) < E, scale, jnp.float32(1.0))
    w_p = (w_sum[:, perm].astype(jnp.float32) * col_scale).astype(mxu_dtype)
    bias_p = (b[perm].astype(jnp.float32) * col_scale).reshape(1, E3)
    gamma2 = gamma.reshape(1, E)
    beta2 = beta.reshape(1, E)

    # ---- per-generation VMEM budget & tiling ----------------------------------
    vmem_cap = _vmem_capacity_bytes()
    vmem_limit = int(min(vmem_cap - 16 * 1024 * 1024, 100 * 1024 * 1024))
    max_tile = 1024 if vmem_cap >= 128 * 1024 * 1024 else 512
    tS = min(S, max_tile)          # ragged last block is fine: row-wise math,
    nS = pl.cdiv(S, tS)            # out-of-bounds writes are clipped by Pallas
    tQ = min(S, 256)
    nQ = pl.cdiv(S, tQ)

    # ---- kernel 1: LayerNorm + fused in-projection, tiled over (batch, seq) ---
    q_arr, kv_arr = pl.pallas_call(
        functools.partial(_proj_kernel, eps=1e-5, embed_dim=E),
        out_shape=(jax.ShapeDtypeStruct((B, S, E), mxu_dtype),
                   jax.ShapeDtypeStruct((B, S, 2 * E), mxu_dtype)),
        grid=(B, nS),
        in_specs=[
            pl.BlockSpec((1, tS, E), lambda i, j: (i, j, 0)),
            _single_buffered((1, E), lambda i, j: (0, 0)),
            _single_buffered((1, E), lambda i, j: (0, 0)),
            _single_buffered((E, E3), lambda i, j: (0, 0)),
            _single_buffered((1, E3), lambda i, j: (0, 0)),
        ],
        out_specs=(pl.BlockSpec((1, tS, E), lambda i, j: (i, j, 0)),
                   pl.BlockSpec((1, tS, 2 * E), lambda i, j: (i, j, 0))),
        compiler_params=pltpu.CompilerParams(
            dimension_semantics=("parallel", "parallel"),
            vmem_limit_bytes=vmem_limit),
    )(x, gamma2, beta2, w_p, bias_p)

    # ---- kernel 2: multi-head attention, tiled over (batch, query tile) -------
    out = pl.pallas_call(
        functools.partial(_attn_kernel, embed_dim=E, head_size=hs, num_heads=H),
        out_shape=jax.ShapeDtypeStruct((B, S, E), x.dtype),
        grid=(B, nQ),
        in_specs=[
            pl.BlockSpec((1, tQ, E), lambda i, j: (i, j, 0)),
            pl.BlockSpec((1, S, 2 * E), lambda i, j: (i, 0, 0)),
        ],
        out_specs=pl.BlockSpec((1, tQ, E), lambda i, j: (i, j, 0)),
        compiler_params=pltpu.CompilerParams(
            dimension_semantics=("parallel", "parallel"),
            vmem_limit_bytes=vmem_limit),
    )(q_arr, kv_arr)
    return out


def reference(x, gamma, beta, w, b, head_size):
    """Pure-JAX transcription of the PyTorch forward, for correctness checking."""
    mean = jnp.mean(x, axis=-1, keepdims=True)
    var = jnp.mean((x - mean) ** 2, axis=-1, keepdims=True)
    xn = (x - mean) / jnp.sqrt(var + 1e-5) * gamma + beta
    xr = jnp.concatenate([xn, xn, xn], axis=-1)
    y = xr @ w.T + b
    B, S, E = x.shape
    H = E // head_size
    qkv = y.reshape(B, S, H, 3 * head_size)
    q = jnp.transpose(qkv[..., :head_size], (0, 2, 1, 3))
    k = jnp.transpose(qkv[..., head_size:2 * head_size], (0, 2, 1, 3))
    v = jnp.transpose(qkv[..., 2 * head_size:], (0, 2, 1, 3))
    s = jnp.einsum("bhqd,bhkd->bhqk", q, k) / jnp.sqrt(jnp.float32(head_size))
    p = jax.nn.softmax(s, axis=-1)
    o = jnp.einsum("bhqk,bhkd->bhqd", p, v)
    return jnp.transpose(o, (0, 2, 1, 3)).reshape(B, S, E)


if __name__ == "__main__":
    # small shapes consistent with the module: embed_dim=32, head_size=8 -> 4 heads
    B, S, E, hs = 2, 8, 32, 8

    key = jax.random.PRNGKey(0)
    kx, kg, kb, kw, kbias = jax.random.split(key, 5)
    x = jax.random.normal(kx, (B, S, E), dtype=jnp.float32)
    # deterministic synthetic parameters (shapes from __init__: LayerNorm(E), Linear(3E,3E))
    gamma = 1.0 + 0.1 * jax.random.normal(kg, (E,), dtype=jnp.float32)
    beta = 0.1 * jax.random.normal(kb, (E,), dtype=jnp.float32)
    w = 0.05 * jax.random.normal(kw, (3 * E, 3 * E), dtype=jnp.float32)
    b = 0.05 * jax.random.normal(kbias, (3 * E,), dtype=jnp.float32)

    fwd = jax.jit(functools.partial(multihead_attention, head_size=hs))
    out = jax.block_until_ready(fwd(x, gamma, beta, w, b))

    ref = reference(x, gamma, beta, w, b, hs)
    assert out.shape == (B, S, E)
    assert jnp.allclose(out, ref, atol=1e-2, rtol=1e-2)
    print("KERNEL_OK")
</pallas_src>

<mosaic_0001>
module attributes {stable_mosaic.version = 11 : i64} {
  func.func @_proj_kernel(%arg0: i32, %arg1: i32, %arg2: memref<1x8x32xf32, #tpu.memory_space<vmem>>, %arg3: memref<1x32xf32, #tpu.memory_space<vmem>>, %arg4: memref<1x32xf32, #tpu.memory_space<vmem>>, %arg5: memref<32x96xbf16, #tpu.memory_space<vmem>>, %arg6: memref<1x96xf32, #tpu.memory_space<vmem>>, %arg7: memref<1x8x32xbf16, #tpu.memory_space<vmem>>, %arg8: memref<1x8x64xbf16, #tpu.memory_space<vmem>>) attributes {dimension_semantics = [#tpu.dimension_semantics<parallel>, #tpu.dimension_semantics<parallel>], iteration_bounds = array<i64: 2, 1>, scalar_prefetch = 0 : i64, scratch_operands = 0 : i64, tpu.core_type = #tpu.core_type<tc>, window_params = [{transform_indices = @transform_0, window_bounds = array<i64: 1, 8, 32>}, {pipeline_mode = #tpu.pipeline_mode<synchronous>, transform_indices = @transform_1, window_bounds = array<i64: 1, 32>}, {pipeline_mode = #tpu.pipeline_mode<synchronous>, transform_indices = @transform_2, window_bounds = array<i64: 1, 32>}, {pipeline_mode = #tpu.pipeline_mode<synchronous>, transform_indices = @transform_3, window_bounds = array<i64: 32, 96>}, {pipeline_mode = #tpu.pipeline_mode<synchronous>, transform_indices = @transform_4, window_bounds = array<i64: 1, 96>}, {transform_indices = @transform_5, window_bounds = array<i64: 1, 8, 32>}, {transform_indices = @transform_6, window_bounds = array<i64: 1, 8, 64>}]} {
    %c0 = arith.constant 0 : index
    %c0_0 = arith.constant 0 : index
    %c0_1 = arith.constant 0 : index
    %0 = vector.load %arg2[%c0, %c0_0, %c0_1] : memref<1x8x32xf32, #tpu.memory_space<vmem>>, vector<1x8x32xf32>
    %1 = vector.shape_cast %0 : vector<1x8x32xf32> to vector<8x32xf32>
    %cst = arith.constant dense<0.000000e+00> : vector<8xf32>
    %2 = vector.multi_reduction <add>, %1, %cst [1] : vector<8x32xf32> to vector<8xf32>
    %3 = vector.shape_cast %2 : vector<8xf32> to vector<8x1xf32>
    %cst_2 = arith.constant 3.200000e+01 : f32
    %4 = vector.broadcast %cst_2 : f32 to vector<8x1xf32>
    %5 = arith.divf %3, %4 : vector<8x1xf32>
    %6 = vector.broadcast %5 : vector<8x1xf32> to vector<8x32xf32>
    %7 = arith.subf %1, %6 : vector<8x32xf32>
    %8 = arith.mulf %7, %7 : vector<8x32xf32>
    %cst_3 = arith.constant dense<0.000000e+00> : vector<8xf32>
    %9 = vector.multi_reduction <add>, %8, %cst_3 [1] : vector<8x32xf32> to vector<8xf32>
    %10 = vector.shape_cast %9 : vector<8xf32> to vector<8x1xf32>
    %cst_4 = arith.constant 3.200000e+01 : f32
    %11 = vector.broadcast %cst_4 : f32 to vector<8x1xf32>
    %12 = arith.divf %10, %11 : vector<8x1xf32>
    %cst_5 = arith.constant 9.99999974E-6 : f32
    %13 = vector.broadcast %cst_5 : f32 to vector<8x1xf32>
    %14 = arith.addf %12, %13 : vector<8x1xf32>
    %15 = math.rsqrt %14 : vector<8x1xf32>
    %16 = vector.broadcast %15 : vector<8x1xf32> to vector<8x32xf32>
    %17 = arith.mulf %7, %16 : vector<8x32xf32>
    %c0_6 = arith.constant 0 : index
    %c0_7 = arith.constant 0 : index
    %18 = vector.load %arg3[%c0_6, %c0_7] : memref<1x32xf32, #tpu.memory_space<vmem>>, vector<1x32xf32>
    %19 = vector.broadcast %18 : vector<1x32xf32> to vector<8x32xf32>
    %20 = arith.mulf %17, %19 : vector<8x32xf32>
    %c0_8 = arith.constant 0 : index
    %c0_9 = arith.constant 0 : index
    %21 = vector.load %arg4[%c0_8, %c0_9] : memref<1x32xf32, #tpu.memory_space<vmem>>, vector<1x32xf32>
    %22 = vector.broadcast %21 : vector<1x32xf32> to vector<8x32xf32>
    %23 = arith.addf %20, %22 : vector<8x32xf32>
    %24 = arith.truncf %23 : vector<8x32xf32> to vector<8x32xbf16>
    %c0_10 = arith.constant 0 : index
    %c0_11 = arith.constant 0 : index
    %25 = vector.load %arg5[%c0_10, %c0_11] : memref<32x96xbf16, #tpu.memory_space<vmem>>, vector<32x96xbf16>
    %cst_12 = arith.constant dense<0.000000e+00> : vector<8x96xf32>
    %26 = tpu.matmul %24, %25, %cst_12 {dimension_numbers = #tpu.dot_dimension_numbers<[1], [0], [0], [1], [0, 0, 1, 1], [], []>} : vector<8x32xbf16>, vector<32x96xbf16>, vector<8x96xf32> -> vector<8x96xf32>
    %c0_13 = arith.constant 0 : index
    %c0_14 = arith.constant 0 : index
    %27 = vector.load %arg6[%c0_13, %c0_14] : memref<1x96xf32, #tpu.memory_space<vmem>>, vector<1x96xf32>
    %28 = vector.broadcast %27 : vector<1x96xf32> to vector<8x96xf32>
    %29 = arith.addf %26, %28 : vector<8x96xf32>
    %30 = vector.extract_strided_slice %29 {offsets = [0, 0], sizes = [8, 32], strides = [1, 1]} : vector<8x96xf32> to vector<8x32xf32>
    %31 = arith.truncf %30 : vector<8x32xf32> to vector<8x32xbf16>
    %c0_15 = arith.constant 0 : index
    %c0_16 = arith.constant 0 : index
    %c0_17 = arith.constant 0 : index
    %32 = vector.load %arg7[%c0_15, %c0_16, %c0_17] : memref<1x8x32xbf16, #tpu.memory_space<vmem>>, vector<1x8x32xbf16>
    %33 = vector.shape_cast %32 : vector<1x8x32xbf16> to vector<8x32xbf16>
    %34 = vector.shape_cast %31 : vector<8x32xbf16> to vector<1x8x32xbf16>
    tpu.vector_store %arg7[%c0_15, %c0_16, %c0_17], %34 {strides = array<i32>} : memref<1x8x32xbf16, #tpu.memory_space<vmem>>, vector<1x8x32xbf16>,
    %35 = vector.extract_strided_slice %29 {offsets = [0, 32], sizes = [8, 64], strides = [1, 1]} : vector<8x96xf32> to vector<8x64xf32>
    %36 = arith.truncf %35 : vector<8x64xf32> to vector<8x64xbf16>
    %c0_18 = arith.constant 0 : index
    %c0_19 = arith.constant 0 : index
    %c0_20 = arith.constant 0 : index
    %37 = vector.load %arg8[%c0_18, %c0_19, %c0_20] : memref<1x8x64xbf16, #tpu.memory_space<vmem>>, vector<1x8x64xbf16>
    %38 = vector.shape_cast %37 : vector<1x8x64xbf16> to vector<8x64xbf16>
    %39 = vector.shape_cast %36 : vector<8x64xbf16> to vector<1x8x64xbf16>
    tpu.vector_store %arg8[%c0_18, %c0_19, %c0_20], %39 {strides = array<i32>} : memref<1x8x64xbf16, #tpu.memory_space<vmem>>, vector<1x8x64xbf16>,
    return
  }
  func.func @transform_0(%arg0: i32, %arg1: i32) -> (i32, i32, i32) {
    %c0_i32 = arith.constant 0 : i32
    %c0_i32_0 = arith.constant 0 : i32
    return %arg0, %arg1, %c0_i32 : i32, i32, i32
  }
  func.func @transform_1(%arg0: i32, %arg1: i32) -> (i32, i32) {
    %c0_i32 = arith.constant 0 : i32
    %c0_i32_0 = arith.constant 0 : i32
    %c0_i32_1 = arith.constant 0 : i32
    return %c0_i32, %c0_i32_0 : i32, i32
  }
  func.func @transform_2(%arg0: i32, %arg1: i32) -> (i32, i32) {
    %c0_i32 = arith.constant 0 : i32
    %c0_i32_0 = arith.constant 0 : i32
    %c0_i32_1 = arith.constant 0 : i32
    return %c0_i32, %c0_i32_0 : i32, i32
  }
  func.func @transform_3(%arg0: i32, %arg1: i32) -> (i32, i32) {
    %c0_i32 = arith.constant 0 : i32
    %c0_i32_0 = arith.constant 0 : i32
    %c0_i32_1 = arith.constant 0 : i32
    return %c0_i32, %c0_i32_0 : i32, i32
  }
  func.func @transform_4(%arg0: i32, %arg1: i32) -> (i32, i32) {
    %c0_i32 = arith.constant 0 : i32
    %c0_i32_0 = arith.constant 0 : i32
    %c0_i32_1 = arith.constant 0 : i32
    return %c0_i32, %c0_i32_0 : i32, i32
  }
  func.func @transform_5(%arg0: i32, %arg1: i32) -> (i32, i32, i32) {
    %c0_i32 = arith.constant 0 : i32
    %c0_i32_0 = arith.constant 0 : i32
    return %arg0, %arg1, %c0_i32 : i32, i32, i32
  }
  func.func @transform_6(%arg0: i32, %arg1: i32) -> (i32, i32, i32) {
    %c0_i32 = arith.constant 0 : i32
    %c0_i32_0 = arith.constant 0 : i32
    return %arg0, %arg1, %c0_i32 : i32, i32, i32
  }
}

module attributes {stable_mosaic.version = 11 : i64} {
  func.func @_attn_kernel(%arg0: i32, %arg1: i32, %arg2: memref<1x8x32xbf16, #tpu.memory_space<vmem>>, %arg3: memref<1x8x64xbf16, #tpu.memory_space<vmem>>, %arg4: memref<1x8x32xf32, #tpu.memory_space<vmem>>) attributes {dimension_semantics = [#tpu.dimension_semantics<parallel>, #tpu.dimension_semantics<parallel>], iteration_bounds = array<i64: 2, 1>, scalar_prefetch = 0 : i64, scratch_operands = 0 : i64, tpu.core_type = #tpu.core_type<tc>, window_params = [{transform_indices = @transform_0, window_bounds = array<i64: 1, 8, 32>}, {transform_indices = @transform_1, window_bounds = array<i64: 1, 8, 64>}, {transform_indices = @transform_2, window_bounds = array<i64: 1, 8, 32>}]} {
    %c0 = arith.constant 0 : index
    %c0_0 = arith.constant 0 : index
    %c0_1 = arith.constant 0 : index
    %0 = vector.load %arg2[%c0, %c0_0, %c0_1] : memref<1x8x32xbf16, #tpu.memory_space<vmem>>, vector<1x8x32xbf16>
    %1 = vector.shape_cast %0 : vector<1x8x32xbf16> to vector<8x32xbf16>
    %c0_2 = arith.constant 0 : index
    %c0_3 = arith.constant 0 : index
    %c0_4 = arith.constant 0 : index
    %2 = vector.load %arg3[%c0_2, %c0_3, %c0_4] : memref<1x8x64xbf16, #tpu.memory_space<vmem>>, vector<1x8x64xbf16>
    %3 = vector.shape_cast %2 : vector<1x8x64xbf16> to vector<8x64xbf16>
    %4 = vector.extract_strided_slice %1 {offsets = [0, 0], sizes = [8, 8], strides = [1, 1]} : vector<8x32xbf16> to vector<8x8xbf16>
    %5 = vector.extract_strided_slice %3 {offsets = [0, 0], sizes = [8, 8], strides = [1, 1]} : vector<8x64xbf16> to vector<8x8xbf16>
    %6 = vector.extract_strided_slice %3 {offsets = [0, 32], sizes = [8, 8], strides = [1, 1]} : vector<8x64xbf16> to vector<8x8xbf16>
    %cst = arith.constant dense<0.000000e+00> : vector<8x8xf32>
    %7 = tpu.matmul %4, %5, %cst {dimension_numbers = #tpu.dot_dimension_numbers<[1], [1], [0], [0], [0, 0, 1, 0], [], []>} : vector<8x8xbf16>, vector<8x8xbf16>, vector<8x8xf32> -> vector<8x8xf32>
    %cst_5 = arith.constant dense<0xFF800000> : vector<8xf32>
    %8 = vector.multi_reduction <maximumf>, %7, %cst_5 [1] : vector<8x8xf32> to vector<8xf32>
    %9 = vector.shape_cast %8 : vector<8xf32> to vector<8x1xf32>
    %10 = vector.broadcast %9 : vector<8x1xf32> to vector<8x8xf32>
    %11 = arith.subf %7, %10 : vector<8x8xf32>
    %12 = math.exp %11 : vector<8x8xf32>
    %cst_6 = arith.constant dense<0.000000e+00> : vector<8xf32>
    %13 = vector.multi_reduction <add>, %12, %cst_6 [1] : vector<8x8xf32> to vector<8xf32>
    %14 = vector.shape_cast %13 : vector<8xf32> to vector<8x1xf32>
    %15 = tpu.reciprocal %14 {approx = true} : vector<8x1xf32> -> vector<8x1xf32>
    %16 = vector.broadcast %15 : vector<8x1xf32> to vector<8x8xf32>
    %17 = arith.mulf %12, %16 : vector<8x8xf32>
    %18 = arith.truncf %17 : vector<8x8xf32> to vector<8x8xbf16>
    %cst_7 = arith.constant dense<0.000000e+00> : vector<8x8xf32>
    %19 = tpu.matmul %18, %6, %cst_7 {dimension_numbers = #tpu.dot_dimension_numbers<[1], [0], [0], [1], [0, 0, 1, 1], [], []>} : vector<8x8xbf16>, vector<8x8xbf16>, vector<8x8xf32> -> vector<8x8xf32>
    %c0_8 = arith.constant 0 : index
    %c0_9 = arith.constant 0 : index
    %c0_10 = arith.constant 0 : index
    %20 = vector.load %arg4[%c0_8, %c0_9, %c0_10] : memref<1x8x32xf32, #tpu.memory_space<vmem>>, vector<1x8x8xf32>
    %21 = vector.shape_cast %20 : vector<1x8x8xf32> to vector<8x8xf32>
    %22 = vector.shape_cast %19 : vector<8x8xf32> to vector<1x8x8xf32>
    tpu.vector_store %arg4[%c0_8, %c0_9, %c0_10], %22 {strides = array<i32>} : memref<1x8x32xf32, #tpu.memory_space<vmem>>, vector<1x8x8xf32>,
    %23 = vector.extract_strided_slice %1 {offsets = [0, 8], sizes = [8, 8], strides = [1, 1]} : vector<8x32xbf16> to vector<8x8xbf16>
    %24 = vector.extract_strided_slice %3 {offsets = [0, 8], sizes = [8, 8], strides = [1, 1]} : vector<8x64xbf16> to vector<8x8xbf16>
    %25 = vector.extract_strided_slice %3 {offsets = [0, 40], sizes = [8, 8], strides = [1, 1]} : vector<8x64xbf16> to vector<8x8xbf16>
    %cst_11 = arith.constant dense<0.000000e+00> : vector<8x8xf32>
    %26 = tpu.matmul %23, %24, %cst_11 {dimension_numbers = #tpu.dot_dimension_numbers<[1], [1], [0], [0], [0, 0, 1, 0], [], []>} : vector<8x8xbf16>, vector<8x8xbf16>, vector<8x8xf32> -> vector<8x8xf32>
    %cst_12 = arith.constant dense<0xFF800000> : vector<8xf32>
    %27 = vector.multi_reduction <maximumf>, %26, %cst_12 [1] : vector<8x8xf32> to vector<8xf32>
    %28 = vector.shape_cast %27 : vector<8xf32> to vector<8x1xf32>
    %29 = vector.broadcast %28 : vector<8x1xf32> to vector<8x8xf32>
    %30 = arith.subf %26, %29 : vector<8x8xf32>
    %31 = math.exp %30 : vector<8x8xf32>
    %cst_13 = arith.constant dense<0.000000e+00> : vector<8xf32>
    %32 = vector.multi_reduction <add>, %31, %cst_13 [1] : vector<8x8xf32> to vector<8xf32>
    %33 = vector.shape_cast %32 : vector<8xf32> to vector<8x1xf32>
    %34 = tpu.reciprocal %33 {approx = true} : vector<8x1xf32> -> vector<8x1xf32>
    %35 = vector.broadcast %34 : vector<8x1xf32> to vector<8x8xf32>
    %36 = arith.mulf %31, %35 : vector<8x8xf32>
    %37 = arith.truncf %36 : vector<8x8xf32> to vector<8x8xbf16>
    %cst_14 = arith.constant dense<0.000000e+00> : vector<8x8xf32>
    %38 = tpu.matmul %37, %25, %cst_14 {dimension_numbers = #tpu.dot_dimension_numbers<[1], [0], [0], [1], [0, 0, 1, 1], [], []>} : vector<8x8xbf16>, vector<8x8xbf16>, vector<8x8xf32> -> vector<8x8xf32>
    %c0_15 = arith.constant 0 : index
    %c0_16 = arith.constant 0 : index
    %c8 = arith.constant 8 : index
    %39 = vector.load %arg4[%c0_15, %c0_16, %c8] : memref<1x8x32xf32, #tpu.memory_space<vmem>>, vector<1x8x8xf32>
    %40 = vector.shape_cast %39 : vector<1x8x8xf32> to vector<8x8xf32>
    %41 = vector.shape_cast %38 : vector<8x8xf32> to vector<1x8x8xf32>
    tpu.vector_store %arg4[%c0_15, %c0_16, %c8], %41 {strides = array<i32>} : memref<1x8x32xf32, #tpu.memory_space<vmem>>, vector<1x8x8xf32>,
    %42 = vector.extract_strided_slice %1 {offsets = [0, 16], sizes = [8, 8], strides = [1, 1]} : vector<8x32xbf16> to vector<8x8xbf16>
    %43 = vector.extract_strided_slice %3 {offsets = [0, 16], sizes = [8, 8], strides = [1, 1]} : vector<8x64xbf16> to vector<8x8xbf16>
    %44 = vector.extract_strided_slice %3 {offsets = [0, 48], sizes = [8, 8], strides = [1, 1]} : vector<8x64xbf16> to vector<8x8xbf16>
    %cst_17 = arith.constant dense<0.000000e+00> : vector<8x8xf32>
    %45 = tpu.matmul %42, %43, %cst_17 {dimension_numbers = #tpu.dot_dimension_numbers<[1], [1], [0], [0], [0, 0, 1, 0], [], []>} : vector<8x8xbf16>, vector<8x8xbf16>, vector<8x8xf32> -> vector<8x8xf32>
    %cst_18 = arith.constant dense<0xFF800000> : vector<8xf32>
    %46 = vector.multi_reduction <maximumf>, %45, %cst_18 [1] : vector<8x8xf32> to vector<8xf32>
    %47 = vector.shape_cast %46 : vector<8xf32> to vector<8x1xf32>
    %48 = vector.broadcast %47 : vector<8x1xf32> to vector<8x8xf32>
    %49 = arith.subf %45, %48 : vector<8x8xf32>
    %50 = math.exp %49 : vector<8x8xf32>
    %cst_19 = arith.constant dense<0.000000e+00> : vector<8xf32>
    %51 = vector.multi_reduction <add>, %50, %cst_19 [1] : vector<8x8xf32> to vector<8xf32>
    %52 = vector.shape_cast %51 : vector<8xf32> to vector<8x1xf32>
    %53 = tpu.reciprocal %52 {approx = true} : vector<8x1xf32> -> vector<8x1xf32>
    %54 = vector.broadcast %53 : vector<8x1xf32> to vector<8x8xf32>
    %55 = arith.mulf %50, %54 : vector<8x8xf32>
    %56 = arith.truncf %55 : vector<8x8xf32> to vector<8x8xbf16>
    %cst_20 = arith.constant dense<0.000000e+00> : vector<8x8xf32>
    %57 = tpu.matmul %56, %44, %cst_20 {dimension_numbers = #tpu.dot_dimension_numbers<[1], [0], [0], [1], [0, 0, 1, 1], [], []>} : vector<8x8xbf16>, vector<8x8xbf16>, vector<8x8xf32> -> vector<8x8xf32>
    %c0_21 = arith.constant 0 : index
    %c0_22 = arith.constant 0 : index
    %c16 = arith.constant 16 : index
    %58 = vector.load %arg4[%c0_21, %c0_22, %c16] : memref<1x8x32xf32, #tpu.memory_space<vmem>>, vector<1x8x8xf32>
    %59 = vector.shape_cast %58 : vector<1x8x8xf32> to vector<8x8xf32>
    %60 = vector.shape_cast %57 : vector<8x8xf32> to vector<1x8x8xf32>
    tpu.vector_store %arg4[%c0_21, %c0_22, %c16], %60 {strides = array<i32>} : memref<1x8x32xf32, #tpu.memory_space<vmem>>, vector<1x8x8xf32>,
    %61 = vector.extract_strided_slice %1 {offsets = [0, 24], sizes = [8, 8], strides = [1, 1]} : vector<8x32xbf16> to vector<8x8xbf16>
    %62 = vector.extract_strided_slice %3 {offsets = [0, 24], sizes = [8, 8], strides = [1, 1]} : vector<8x64xbf16> to vector<8x8xbf16>
    %63 = vector.extract_strided_slice %3 {offsets = [0, 56], sizes = [8, 8], strides = [1, 1]} : vector<8x64xbf16> to vector<8x8xbf16>
    %cst_23 = arith.constant dense<0.000000e+00> : vector<8x8xf32>
    %64 = tpu.matmul %61, %62, %cst_23 {dimension_numbers = #tpu.dot_dimension_numbers<[1], [1], [0], [0], [0, 0, 1, 0], [], []>} : vector<8x8xbf16>, vector<8x8xbf16>, vector<8x8xf32> -> vector<8x8xf32>
    %cst_24 = arith.constant dense<0xFF800000> : vector<8xf32>
    %65 = vector.multi_reduction <maximumf>, %64, %cst_24 [1] : vector<8x8xf32> to vector<8xf32>
    %66 = vector.shape_cast %65 : vector<8xf32> to vector<8x1xf32>
    %67 = vector.broadcast %66 : vector<8x1xf32> to vector<8x8xf32>
    %68 = arith.subf %64, %67 : vector<8x8xf32>
    %69 = math.exp %68 : vector<8x8xf32>
    %cst_25 = arith.constant dense<0.000000e+00> : vector<8xf32>
    %70 = vector.multi_reduction <add>, %69, %cst_25 [1] : vector<8x8xf32> to vector<8xf32>
    %71 = vector.shape_cast %70 : vector<8xf32> to vector<8x1xf32>
    %72 = tpu.reciprocal %71 {approx = true} : vector<8x1xf32> -> vector<8x1xf32>
    %73 = vector.broadcast %72 : vector<8x1xf32> to vector<8x8xf32>
    %74 = arith.mulf %69, %73 : vector<8x8xf32>
    %75 = arith.truncf %74 : vector<8x8xf32> to vector<8x8xbf16>
    %cst_26 = arith.constant dense<0.000000e+00> : vector<8x8xf32>
    %76 = tpu.matmul %75, %63, %cst_26 {dimension_numbers = #tpu.dot_dimension_numbers<[1], [0], [0], [1], [0, 0, 1, 1], [], []>} : vector<8x8xbf16>, vector<8x8xbf16>, vector<8x8xf32> -> vector<8x8xf32>
    %c0_27 = arith.constant 0 : index
    %c0_28 = arith.constant 0 : index
    %c24 = arith.constant 24 : index
    %77 = vector.load %arg4[%c0_27, %c0_28, %c24] : memref<1x8x32xf32, #tpu.memory_space<vmem>>, vector<1x8x8xf32>
    %78 = vector.shape_cast %77 : vector<1x8x8xf32> to vector<8x8xf32>
    %79 = vector.shape_cast %76 : vector<8x8xf32> to vector<1x8x8xf32>
    tpu.vector_store %arg4[%c0_27, %c0_28, %c24], %79 {strides = array<i32>} : memref<1x8x32xf32, #tpu.memory_space<vmem>>, vector<1x8x8xf32>,
    return
  }
  func.func @transform_0(%arg0: i32, %arg1: i32) -> (i32, i32, i32) {
    %c0_i32 = arith.constant 0 : i32
    %c0_i32_0 = arith.constant 0 : i32
    return %arg0, %arg1, %c0_i32 : i32, i32, i32
  }
  func.func @transform_1(%arg0: i32, %arg1: i32) -> (i32, i32, i32) {
    %c0_i32 = arith.constant 0 : i32
    %c0_i32_0 = arith.constant 0 : i32
    %c0_i32_1 = arith.constant 0 : i32
    return %arg0, %c0_i32, %c0_i32_0 : i32, i32, i32
  }
  func.func @transform_2(%arg0: i32, %arg1: i32) -> (i32, i32, i32) {
    %c0_i32 = arith.constant 0 : i32
    %c0_i32_0 = arith.constant 0 : i32
    return %arg0, %arg1, %c0_i32 : i32, i32, i32
  }
}

</mosaic_0001>

<bundles_post_ra>
// kernel: multihead_attention.3
= control target key start
LH: loop header
LB: loop body
LE: loop exit
PB: predicated region body
PF: predicated region fallthrough
CT: control target
= control target key end

     0   :  { %7 = vsyncpa [#allocation3], 0  ;;  %s882_s0 = inlined_call_operand.vmem [shape: bf16[2,8,32], index: 0, kind: input, shape index: {}]   ;;  %s883_s1 = inlined_call_operand.vmem [shape: bf16[2,8,64], index: 1, kind: input, shape index: {}]   ;;  %s884_s2 = inlined_call_operand.hbm [shape: f32[2,8,32], index: 2, kind: output, shape index: {}]  }
   0x1   :  { %9 = vsyncpa [#allocation3 + $0x1], 0  ;;  %s737_s9 = smov 0   ;;  %s739_s10 = smov 0  }
   0x2   :  { %s741_s11 = smov 0   ;;  %s743_s12 = smov 0  }
   0x3   :  { %s745_s13 = smov 0   ;;  %s747_s14 = smov 0  }
   0x4 LB: > { %s531_s15 = sadd.s32 4294967295, %s710_s14   ;;  %s532_s16 = sadd.s32 4294967294, %s710_s14   ;;  %s710_s14 = sphi %s747_s14, %s15_s14   ;;  %s706_s13 = sphi %s745_s13, %s891_s13   ;;  %s702_s12 = sphi %s743_s12, %s890_s12   ;;  %s698_s11 = sphi %s741_s11, %s889_s11   ;;  %s694_s10 = sphi %s739_s10, %s888_s10   ;;  %s690_s9 = sphi %s737_s9, %s887_s9  }
   0x5   : > { %s27_s17 = sadd.s32 1, %s706_s13  ;;  %s90_s18 = sadd.s32 1, %s698_s11 }
   0x6   : > { %p29_p0 = scmp.ge.s32.totalorder %s27_s17, 2  ;;  %p100_p1 = scmp.ne.s32.totalorder %s698_s11, %s694_s10 }
   0x7   : > { %p101_p2 = scmp.eq.s32.totalorder %s531_s15, 1  ;;  %p106_p3 = scmp.ne.s32.totalorder %s694_s10, %s690_s9 }
   0x8   : > { %s893_s17 = smov (%p29_p0, %s27_s17), 0  ;;  %p107_p5 = scmp.eq.s32.totalorder %s532_s16, 1 }
   0x9   : > { %p777_p4 = por %p101_p2, %p100_p1  ;;  %s85_s20 = ssub.s32 %s706_s13, %s893_s17 }
   0xa   : > { %p535_p6 = scmp.ge.s32.totalorder %s710_s14, 1  ;;  %p88_p7 = scmp.eq.s32.totalorder %s85_s20, 0 }
   0xb   : > { %p784_p8 = por %p107_p5, %p106_p3  ;;  %p142_p9 = scmp.lt.s32.totalorder %s710_s14, 3 }
   0xc   : > { %s790_s22 = scalar_select %p88_p7, %s698_s11, %s90_s18  }
   0xd   : > { %p143_p10 = pnand %p535_p6, %p142_p9 }
   0xe   : > { %p170_p11 = scmp.lt.s32.totalorder (!%p143_p10), %s702_s12, 1  ;;  %s712_s3 = smov (!%p143_p10), 96  }
   0xf   : > { %146 = sbr.rel (%p143_p10) target bundleno = 1083 (0x43b), region = 28  ;;  %s713_s4 = smov (!%p143_p10), 112  }
  0x10   : > { %s714_s5 = smov (!%p143_p10), 104   ;;  %s715_s6 = smov (!%p143_p10), 120  }
  0x11   : > { %s167_s7 = sand.u32 (!%p143_p10), 1, %s694_s10   ;;  %s716_s16 = smov (!%p143_p10), 88  }
  0x12   : > { %s536_s8 = sshll.u32 (!%p143_p10), %s167_s7, 3  ;;  %s717_s18 = smov (!%p143_p10), 80  }
  0x13   : > { %s822_s15 = scalar_lea.vmem (!%p143_p10), [#allocation2], %s536_s8  ;;  %s718_s20 = smov (!%p143_p10), 72  }
  0x14   : > { %s171_s23 = scalar_select %p170_p11, %s702_s12, 1  ;;  %vm184_vm0 = vcmask 64512   ;;  %vm224_vm1 = vcmask 1043456   ;;  %vm305_vm2 = vcmask 130112   ;;  %vm367_vm3 = vcmask 195712  }
  0x15   : > { %s721_s25 = smov 16   ;;  %s548_s26 = sshll.u32 %s702_s12, 3  ;;  %vm429_vm4 = vcmask 261312  }
  0x16   : > { %s537_s24 = sshll.u32 %s171_s23, 2  ;;  %s719_s23 = smov 8  }
  0x17   : > { %s180_s27 = scalar_lea.vmem %s883_s1, %s537_s24  ;;  %s176_s30 = scalar_lea.vmem %s882_s0, %s537_s24 }
  0x18   : > { %v183_v0 = vld [vmem:[%s180_s27] sm:$0xf]  ;;  %s720_s24 = smov 24   ;;  %s443_s29 = scalar_lea.hbm %s884_s2, %s548_s26 }
  0x19   : > { %v189_v1 = vsel %vm184_vm0, %v183_v0, 0  ;;  %v182_v2 = vld [vmem:[%s176_s30] sm:$0xf]  ;;  %v217_v3 = vunpack.c.l.b16 %v183_v0  ;;  %s445_s30 = sshll.u32 %s822_s15, 4  ;;  %s446_s30 = int_to_ptr.vmem [resolvable:$true] %s445_s30 }
  0x1a   : > { %198 = vmatpush.bf16.xpose.msra.mxu0 %v189_v1  ;;  %v243_v5 = vunpack.c.l.b16 %v182_v2 }
  0x1b   : > { %v802_v4 = vpack.c.b16 %v217_v3, %v217_v3 }
  0x1c   : > { %v244_v6 = vpack.c.b16 %v243_v5, %v243_v5 }
  0x1d   : > { %219 = vrot.lane.b32.xlu2 %v802_v4, %s712_s3  ;;  %s447_s3 = sshll.u32 %s443_s29, 4  ;;  %s448_s3 = int_to_ptr.hbm [resolvable:$true] %s447_s3 }
  0x21   : > { %539 = vmatmul.msk.bf16.vlgmr.msra.gmra.mxu0 %vm184_vm0, %v182_v2 }
  0x25   : > { %309 = vrot.lane.b32.xlu2 %v802_v4, %s713_s4 }
  0x2d   : > { %371 = vrot.lane.b32.xlu2 %v802_v4, %s714_s5 }
  0x35   : > { %307 = vrot.lane.b32.xlu2 %v244_v6, %s713_s4  ;;  %s432_s4 = scalar_lea.sflag [#allocation3], %s167_s7 }
  0x77   : > { %v220_v10 = vpop.permute.xlu2 %219 }
  0x78   : > { %v226_v21 = vsel %vm224_vm1, %v220_v10, 0 }
  0x79   : > { %235 = vmatpush.bf16.msra.mxu1 %v226_v21 }
  0x7f   : > { %v310_v11 = vpop.permute.xlu2 %309 }
  0x80   : > { %v315_v22 = vsel %vm184_vm0, %v310_v11, 0 }
  0x81   : > { %324 = vmatpush.bf16.xpose.msrb.mxu1 %v315_v22 }
  0x87   : > { %v372_v15 = vpop.permute.xlu2 %371 }
  0x88   : > { %v377_v16 = vsel %vm184_vm0, %v372_v15, 0 }
  0x89   : > { %386 = vmatpush.bf16.xpose.msrb.mxu0 %v377_v16 }
  0x8f   : > { %v308_v29 = vpop.permute.xlu2 %307 }
  0x9e   : > { %v200_v7 = vpop.f32.mrf.mxu0 }
  0x9f   : > { %v204_v8 = vsel %vm184_vm0, %v200_v7, -inf }
  0xa0   : > { %205 = vmax.xlane.f32.xlu0 %v204_v8 }
  0xa6   : > { %v202_v9 = vpop.f32.mrf.mxu0 }
  0xb4   : > { %247 = vrot.lane.b32.xlu0 %v802_v4, %s715_s6 }
  0xbc   : > { %369 = vrot.lane.b32.xlu0 %v244_v6, %s714_s5  ;;  %s646_s5 = sshra.s32 %s448_s3, 4  ;;  %s647_s5 = int_to_ptr.hbm [resolvable:$true] %s646_s5 }
  0xbd   : > { %s648_s12 = scalar_lea.hbm %s647_s5, 8  ;;  %p653_p1 = scmp.lt.s32.totalorder %s647_s5, %s884_s2 }
  0xbe   : > { %p649_p12 = scmp.ne.s32.totalorder %s647_s5, %s648_s12 }
  0xc0   : > { %p650_p13 = pnand %p649_p12, %p777_p4 }
  0xc2   : > { %p651_p0 = pneg %p650_p13 }
 0x113   : > { %v206_v12 = vpop.xlane.xlu0 %205 }
 0x114   : > { %v207_v13 = vsub.f32 %v200_v7, %v206_v12 }
 0x116   : > { %v208_v14 = vmul.f32 1.442695, %v207_v13 }
 0x118   : > { %616 = vpow2.f32 %v208_v14 }
 0x11e   : > { %v617_v17 = vpop.eup %616 }
 0x11f   : > { %v210_v18 = vsel %vm184_vm0, %v617_v17, 0.0 }
 0x120   : > { %211 = vadd.xlane.f32.xlu1 %v210_v18 }
 0x126   : > { %v248_v19 = vpop.permute.xlu0 %247 }
 0x127   : > { %v253_v23 = vsel %vm184_vm0, %v248_v19, 0 }
 0x128   : > { %262 = vmatpush.bf16.xpose.msra.mxu2 %v253_v23 }
 0x12e   : > { %v370_v20 = vpop.permute.xlu0 %369 }
 0x12f   : > { %545 = vmatmul.msk.bf16.vlgmr.msrb.gmra.mxu0 %vm184_vm0, %v370_v20 }
 0x139   : > { %245 = vrot.lane.b32.xlu1 %v244_v6, %s715_s6 }
 0x193   : > { %v212_v24 = vpop.xlane.xlu1 %211 }
 0x194   : > { %618 = vrcp.f32 %v212_v24 }
 0x19a   : > { %v619_v25 = vpop.eup %618 }
 0x19b   : > { %v214_v26 = vmul.f32 %v619_v25, %v617_v17 }
 0x19d   : > { %v215_v27 = vpack.c.bf16 %v214_v26, %v214_v26 }
 0x19f   : > { %540 = vmatmul.msk.bf16.vlgmr.msra.gmra.mxu1 %vm184_vm0, %v215_v27 }
 0x1ab   : > { %v246_v28 = vpop.permute.xlu1 %245 }
 0x1ac   : > { %541 = vmatmul.msk.bf16.vlgmr.msra.gmra.mxu2 %vm184_vm0, %v246_v28  ;;  %v388_v30 = vpop.f32.mrf.mxu0 }
 0x1ad   : > { %v392_v31 = vsel %vm184_vm0, %v388_v30, -inf }
 0x1ae   : > { %393 = vmax.xlane.f32.xlu0 %v392_v31 }
 0x1af   : > { %543 = vmatmul.msk.bf16.vlgmr.msrb.gmra.mxu1 %vm184_vm0, %v308_v29 }
 0x1b4   : > { %v390_v32 = vpop.f32.mrf.mxu0 }
 0x21c   : > { %v237_v33 = vpop.f32.mrf.mxu1 }
 0x21d   : > { %241 = vst.msk [vmem:[%s822_s15] sm:$0xff] %vm184_vm0, %v237_v33 }
 0x221   : > { %v394_v43 = vpop.xlane.xlu0 %393 }
 0x222   : > { %v395_v47 = vsub.f32 %v388_v30, %v394_v43 }
 0x224   : > { %v239_v34 = vpop.f32.mrf.mxu1  ;;  %v396_v49 = vmul.f32 1.442695, %v395_v47 }
 0x22c   : > { %v326_v35 = vpop.f32.mrf.mxu1 }
 0x22d   : > { %v330_v36 = vsel %vm184_vm0, %v326_v35, -inf }
 0x22e   : > { %331 = vmax.xlane.f32.xlu1 %v330_v36 }
 0x22f   : > { %v264_v37 = vpop.f32.mrf.mxu2 }
 0x230   : > { %v268_v38 = vsel %vm184_vm0, %v264_v37, -inf }
 0x231   : > { %269 = vmax.xlane.f32.xlu2 %v268_v38 }
 0x234   : > { %v328_v39 = vpop.f32.mrf.mxu1 }
 0x237   : > { %v266_v40 = vpop.f32.mrf.mxu2 }
 0x247   : > { %280 = vrot.lane.b32.xlu1 %v802_v4, %s716_s16  ;;  %s652_s16 = scalar_lea.hbm %s884_s2, 16 }
 0x248   : > { %p654_p2 = scmp.lt.s32.totalorder %s652_s16, %s648_s12 }
 0x24a   : > { %p655_p3 = por %p654_p2, %p653_p1 }
 0x24c   : > { %p656_p5 = pnand %p655_p3, %p651_p0 }
 0x2a1   : > { %v332_v41 = vpop.xlane.xlu1 %331 }
 0x2a2   : > { %v333_v42 = vsub.f32 %v326_v35, %v332_v41 }
 0x2a4   : > { %v334_v44 = vmul.f32 1.442695, %v333_v42  ;;  %v270_v45 = vpop.xlane.xlu2 %269 }
 0x2a5   : > { %v271_v46 = vsub.f32 %v264_v37, %v270_v45 }
 0x2a6   : > { %620 = vpow2.f32 %v334_v44 }
 0x2a7   : > { %v272_v48 = vmul.f32 1.442695, %v271_v46 }
 0x2a9   : > { %622 = vpow2.f32 %v272_v48 }
 0x2aa   : > { %624 = vpow2.f32 %v396_v49 }
 0x2ac   : > { %v621_v50 = vpop.eup %620 }
 0x2ad   : > { %v336_v51 = vsel %vm184_vm0, %v621_v50, 0.0 }
 0x2ae   : > { %337 = vadd.xlane.f32.xlu0 %v336_v51 }
 0x2af   : > { %v623_v52 = vpop.eup %622 }
 0x2b0   : > { %v274_v53 = vsel %vm184_vm0, %v623_v52, 0.0  ;;  %v625_v54 = vpop.eup %624 }
 0x2b1   : > { %275 = vadd.xlane.f32.xlu2 %v274_v53  ;;  %v398_v55 = vsel %vm184_vm0, %v625_v54, 0.0 }
 0x2b9   : > { %399 = vadd.xlane.f32.xlu2 %v398_v55  ;;  %v281_v56 = vpop.permute.xlu1 %280 }
 0x2ba   : > { %v286_v57 = vsel %vm224_vm1, %v281_v56, 0 }
 0x2bb   : > { %295 = vmatpush.bf16.msra.mxu3 %v286_v57 }
 0x2c2   : > { %342 = vrot.lane.b32.xlu0 %v802_v4, %s717_s18 }
 0x2d1   : > { %404 = vrot.lane.b32.xlu2 %v802_v4, %s718_s20 }
 0x321   : > { %v338_v60 = vpop.xlane.xlu0 %337 }
 0x324   : > { %v276_v58 = vpop.xlane.xlu2 %275 }
 0x325   : > { %626 = vrcp.f32 %v276_v58 }
 0x32b   : > { %v627_v59 = vpop.eup %626 }
 0x32c   : > { %v400_v61 = vpop.xlane.xlu2 %399  ;;  %v278_v62 = vmul.f32 %v627_v59, %v623_v52 }
 0x32d   : > { %628 = vrcp.f32 %v400_v61 }
 0x32e   : > { %v279_v63 = vpack.c.bf16 %v278_v62, %v278_v62  ;;  %630 = vrcp.f32 %v338_v60 }
 0x330   : > { %542 = vmatmul.msk.bf16.vlgmr.msra.gmra.mxu3 %vm184_vm0, %v279_v63 }
 0x333   : > { %v629_v0 = vpop.eup %628 }
 0x334   : > { %v402_v1 = vmul.f32 %v629_v0, %v625_v54  ;;  %v405_v2 = vpop.permute.xlu2 %404  ;;  %v343_v3 = vpop.permute.xlu0 %342 }
 0x335   : > { %v348_v4 = vsel %vm224_vm1, %v343_v3, 0  ;;  %v410_v5 = vsel %vm224_vm1, %v405_v2, 0  ;;  %v631_v7 = vpop.eup %630 }
 0x336   : > { %357 = vmatpush.bf16.msrb.mxu3 %v348_v4  ;;  %419 = vmatpush.bf16.msrb.mxu2 %v410_v5  ;;  %v403_v6 = vpack.c.bf16 %v402_v1, %v402_v1  ;;  %v340_v8 = vmul.f32 %v631_v7, %v621_v50 }
 0x338   : > { %v341_v9 = vpack.c.bf16 %v340_v8, %v340_v8 }
 0x339   : > { %546 = vmatmul.msk.bf16.vlgmr.msrb.gmra.mxu2 %vm184_vm0, %v403_v6 }
 0x340   : > { %544 = vmatmul.msk.bf16.vlgmr.msrb.gmra.mxu3 %vm184_vm0, %v341_v9 }
 0x3b3   : > { %v297_v10 = vpop.f32.mrf.mxu3 }
 0x3b4   : > { %302 = vrot.lane.b32.xlu1 %v297_v10, %s719_s23 }
 0x3bb   : > { %v299_v11 = vpop.f32.mrf.mxu3 }
 0x3bc   : > { %v421_v12 = vpop.f32.mrf.mxu2 }
 0x3bd   : > { %426 = vrot.lane.b32.xlu1 %v421_v12, %s720_s24 }
 0x3c3   : > { %v359_v13 = vpop.f32.mrf.mxu3 }
 0x3c4   : > { %v423_v14 = vpop.f32.mrf.mxu2  ;;  %364 = vrot.lane.b32.xlu0 %v359_v13, %s721_s25 }
 0x3cb   : > { %v361_v15 = vpop.f32.mrf.mxu3 }
 0x426   : > { %v303_v16 = vpop.permute.xlu1 %302 }
 0x427   : > { %306 = vst.msk [vmem:[%s822_s15] sm:$0xff] %vm305_vm2, %v303_v16 }
 0x42f   : > { %v427_v18 = vpop.permute.xlu1 %426 }
 0x436   : > { %v365_v17 = vpop.permute.xlu0 %364 }
 0x437   : > { %368 = vst.msk [vmem:[%s822_s15] sm:$0xff] %vm367_vm3, %v365_v17 }
 0x438   : > { %430 = vst.msk [vmem:[%s822_s15] sm:$0xff] %vm429_vm4, %v427_v18 }
 0x439   : > { %659 = shalt.err (!%p656_p5)
}
 0x43a   : > { %551 = dma.vmem_to_hbm [thread:$0]  (%p777_p4), %s446_s30, 128, %s448_s3, %s432_s4  }
 0x43b PF: > { %p557_p6 = scmp.ge.s32.totalorder %s710_s14, 2  ;;  %s459_s7 = sand.u32 1, %s690_s9  }
 0x43c   : > { %s460_s15 = scalar_lea.sflag [#allocation3], %s459_s7 }
 0x43d   : > { %p554_p7 = pnand %p557_p6, %p784_p8 }
 0x43f   : > { %p555_p9 = pneg %p554_p7 }
 0x441   : > { %685 = dma.done.wait (%p555_p9), %s460_s15, 128  }
 0x442   : > { %687 = vsyncadd (%p555_p9), %s460_s15, 4294967168  ;;  %s15_s14 = sadd.s32 1, %s710_s14   ;;  %s887_s9 = smov %s694_s10 }
 0x443   : > { %p12_p10 = scmp.ge.s32.totalorder %s15_s14, 4   ;;  %s888_s10 = smov %s698_s11 }
 0x444   : > { %s889_s11 = smov %s790_s22  ;;  %s890_s12 = smov %s706_s13 }
 0x445   : > { %s891_s13 = smov %s893_s17  ;;  %14 = sbr.rel (!%p12_p10) target bundleno = 4 (0x4), region = 66 }
 0x44a   :  { %466 = vsyncpa [#allocation3], 1 }
 0x44b   :  { %468 = vsyncpa [#allocation3 + $0x1], 1 }

// kernel: multihead_attention.2
= control target key start
LH: loop header
LB: loop body
LE: loop exit
PB: predicated region body
PF: predicated region fallthrough
CT: control target
= control target key end

     0   :  { %s615_s21 = smov 0   ;;  %s617_s22 = smov 0   ;;  %s673_s0 = inlined_call_operand.vmem [shape: f32[2,8,32], index: 0, kind: input, shape index: {}]   ;;  %s674_s1 = inlined_call_operand.vmem [shape: f32[1,32], index: 1, kind: input, shape index: {}]   ;;  %s675_s2 = inlined_call_operand.vmem [shape: f32[1,32], index: 2, kind: input, shape index: {}]   ;;  %s676_s3 = inlined_call_operand.vmem [shape: bf16[32,96], index: 3, kind: input, shape index: {}]   ;;  %s677_s4 = inlined_call_operand.vmem [shape: f32[1,96], index: 4, kind: input, shape index: {}]   ;;  %s678_s5 = inlined_call_operand.vmem [shape: bf16[2,8,32], index: 5, kind: output, shape index: {0}]   ;;  %s679_s6 = inlined_call_operand.vmem [shape: bf16[2,8,64], index: 6, kind: output, shape index: {1}]  }
   0x1   :  { %s619_s23 = smov 0  }
   0x2 LB: > { %s29_s24 = sadd.s32 1, %s572_s22  ;;  %p504_p0 = scmp.ge.s32.totalorder %s576_s23, 1  ;;  %s576_s23 = sphi %s619_s23, %s17_s23   ;;  %s572_s22 = sphi %s617_s22, %s681_s22   ;;  %s568_s21 = sphi %s615_s21, %s680_s21  }
   0x3   : > { %p31_p1 = scmp.ge.s32.totalorder %s29_s24, 2  ;;  %p235_p2 = scmp.lt.s32.totalorder %s576_s23, 3 }
   0x5   : > { %s683_s24 = smov (%p31_p1, %s29_s24), 0  ;;  %p236_p3 = pnand %p504_p0, %p235_p2 }
   0x6   : > { %p276_p4 = scmp.lt.s32.totalorder (!%p236_p3), %s568_s21, 1  ;;  %s579_s19 = smov (!%p236_p3), 96  }
   0x7   : > { %239 = sbr.rel (%p236_p3) target bundleno = 532 (0x214), region = 40 }
   0xc   : > { %s685_s21 = smov (!%p276_p4, %s568_s21), 1  ;;  %vm299_vm0 = vcmask 261120   ;;  %v578_v2 = vmov 32.0   ;;  %v520_v14 = vld [vmem:[%s676_s3 + $0x8] sm:$0xff]  ;;  %v519_v15 = vld [vmem:[%s676_s3] sm:$0xff]  ;;  %vm377_vm5 = vcmask 257024  }
   0xd   : > { %s505_s25 = sshll.u32 %s685_s21, 3  ;;  %550 = vrcp.f32 %v578_v2  ;;  %369 = vmatpush.bf16.msra.mxu0 %v520_v14  ;;  %v547_v25 = vld [vmem:[%s674_s1] ss:$0 sm:$0xff]  ;;  %s506_s15 = sshll.u32 %s685_s21, 2  ;;  %vm383_vm6 = vcmask 519168  }
   0xe   : > { %s282_s28 = scalar_lea.vmem %s673_s0, %s505_s25  ;;  %v548_v28 = vld [vmem:[%s675_s2] ss:$0 sm:$0xff]  ;;  %s289_s18 = scalar_lea.vmem %s678_s5, %s506_s15 }
   0xf   : > { %v298_v0 = vld [vmem:[%s282_s28] sm:$0xff]  ;;  %s296_s26 = scalar_lea.vmem %s679_s6, %s506_s15 }
  0x10   : > { %v300_v1 = vsel %vm299_vm0, %v298_v0, 0.0  ;;  %v549_v32 = vld [vmem:[%s677_s4] ss:$0 sm:$0xff] }
  0x11   : > { %301 = vadd.xlane.f32.xlu0 %v300_v1  ;;  %370 = vmatpush.bf16.msra.mxu0 %v519_v15 }
  0x13   : > { %v551_v3 = vpop.eup %550 }
  0x14   : > { %v304_v4 = vmul.f32 32.0, %v551_v3  ;;  %vm308_vm1 = vweird.f32 %v551_v3 }
  0x16   : > { %v305_v5 = vsub.f32 1.0, %v304_v4 }
  0x18   : > { %v306_v6 = vmul.f32 %v551_v3, %v305_v5 }
  0x1a   : > { %v307_v7 = vadd.f32 %v551_v3, %v306_v6 }
  0x1c   : > { %v309_v8 = vsel %vm308_vm1, %v551_v3, %v307_v7 }
  0x84   : > { %v302_v9 = vpop.xlane.xlu0 %301 }
  0x85   : > { %v310_v10 = vmul.f32 %v309_v8, %v302_v9 }
  0x87   : > { %v311_v11 = vsub.f32 %v298_v0, %v310_v10 }
  0x89   : > { %v312_v12 = vmul.f32 %v311_v11, %v311_v11 }
  0x8b   : > { %v313_v13 = vsel %vm299_vm0, %v312_v12, 0.0 }
  0x8c   : > { %314 = vadd.xlane.f32.xlu0 %v313_v13 }
  0xff   : > { %v315_v16 = vpop.xlane.xlu0 %314 }
 0x100   : > { %v316_v17 = vmul.f32 %v315_v16, %v309_v8 }
 0x102   : > { %v317_v18 = vadd.f32 1e-05, %v316_v17 }
 0x104   : > { %552 = vrsqrt.f32 %v317_v18  ;;  %vm324_vm3 = vweird.f32 %v317_v18 }
 0x10a   : > { %v553_v19 = vpop.eup %552 }
 0x10b   : > { %v319_v20 = vmul.f32 %v553_v19, %v317_v18  ;;  %vm325_vm2 = vweird.f32 %v553_v19 }
 0x10c   : > { %vm326_vm4 = vmor %vm324_vm3, %vm325_vm2 }
 0x10d   : > { %v320_v21 = vmul.f32 %v553_v19, %v319_v20 }
 0x10f   : > { %v321_v22 = vmul.f32 0.5, %v320_v21 }
 0x111   : > { %v322_v23 = vsub.f32 1.5, %v321_v22 }
 0x113   : > { %v323_v24 = vmul.f32 %v553_v19, %v322_v23 }
 0x115   : > { %v327_v26 = vsel %vm326_vm4, %v553_v19, %v323_v24 }
 0x116   : > { %v328_v27 = vmul.f32 %v327_v26, %v311_v11 }
 0x118   : > { %v333_v29 = vmul.f32 %v547_v25, %v328_v27 }
 0x11a   : > { %v338_v30 = vadd.f32 %v548_v28, %v333_v29 }
 0x11c   : > { %v339_v31 = vpack.c.bf16 %v338_v30, %v338_v30 }
 0x11e   : > { %516 = vmatmul.msk.bf16.vlgmr.msra.gmra.mxu0 %vm299_vm0, %v339_v31 }
 0x19b   : > { %v372_v33 = vpop.f32.mrf.mxu0 }
 0x19c   : > { %v373_v34 = vadd.f32 %v549_v32, %v372_v33 }
 0x19e   : > { %v376_v35 = vpack.c.bf16 %v373_v34, %v373_v34 }
 0x1a0   : > { %380 = vrot.lane.b32.xlu1 %v376_v35, %s579_s19  ;;  %378 = vst.msk [vmem:[%s289_s18] sm:$0xf] %vm377_vm5, %v376_v35 }
 0x1a3   : > { %v374_v36 = vpop.f32.mrf.mxu0 }
 0x212   : > { %v381_v37 = vpop.permute.xlu1 %380 }
 0x213   : > { %384 = vst.msk [vmem:[%s296_s26] sm:$0xf] %vm383_vm6, %v381_v37 }
 0x214 PF: > { %s17_s23 = sadd.s32 1, %s576_s23   ;;  %s680_s21 = smov %s572_s22 }
 0x215   : > { %p14_p5 = scmp.ge.s32.totalorder %s17_s23, 4   ;;  %s681_s22 = smov %s683_s24 }
 0x217   :  { %16 = sbr.rel (!%p14_p5) target bundleno = 2 (0x2), region = 82 }

</bundles_post_ra>
